<compile_context>
chip_gen: v5e
topology: v5e:2x2
jax: 0.10.0
libtpu: 0.0.40
codegen_flags: <defaults>
</compile_context>

<pallas_src>
import jax
import jax.numpy as jnp
from jax.experimental import pallas as pl
from jax.experimental.pallas import tpu as pltpu


def discriminator_kernel(x_ref, w1_ref, b1_ref, w2_ref, b2_ref, o_ref):
    # Layer 1 on the MXU: (TB, D) @ (D, H) with f32 accumulation; bias+ReLU on VPU.
    h = jnp.dot(x_ref[...], w1_ref[...], preferred_element_type=jnp.float32)
    h = jnp.maximum(h + b1_ref[...], 0.0)

    # Layer 2 off the MXU: (TB, H) * (1, H) broadcast-multiply then lane-reduce (XLU).
    y = jnp.sum(h * w2_ref[...], axis=-1, keepdims=True) + b2_ref[0, 0]

    # Exact sigmoid: exp lands on the EUP; the divide's reciprocal does too.
    # Kernel is memory-bound, so exact (vs. approx) costs nothing in wall clock.
    o_ref[...] = 1.0 / (1.0 + jnp.exp(-y))


def discriminator_forward(x, w1, b1, w2, b2, tb_max=1024):
    """Discriminator forward pass.

    x : (B, D) f32
    w1: (D, H) f32  (transposed vs. PyTorch nn.Linear weight)
    b1: (1, H) f32
    w2: (1, H) f32  (PyTorch layout of the second Linear's weight)
    b2: (1, 1) f32
    Returns (B, 1) f32 in (0, 1).
    """
    B, D = x.shape
    H = w1.shape[1]

    # --- Tile-size selection --------------------------------------------------
    # Largest TB (multiple of 8) whose double-buffered x tile comfortably fits
    # VMEM on every chip (v7x: 64 MiB physical / 32 MiB scoped default).
    per_buffer_budget = 8 * 1024 * 1024               # bytes per x buffer (x2 in flight)
    tb = (per_buffer_budget // (D * 4)) // 8 * 8
    tb = max(8, min(tb, tb_max))
    b_padded_to_8 = ((B + 7) // 8) * 8
    tb = min(tb, b_padded_to_8)

    # Pad the batch to a multiple of TB; padded rows are sliced off at the end.
    b_padded = ((B + tb - 1) // tb) * tb
    if b_padded != B:
        x = jnp.pad(x, ((0, b_padded - B), (0, 0)))
    grid = (b_padded // tb,)

    out = pl.pallas_call(
        discriminator_kernel,
        out_shape=jax.ShapeDtypeStruct((b_padded, 1), jnp.float32),
        grid=grid,
        in_specs=[
            # Streamed input: the only per-step HBM traffic (auto double-buffered).
            pl.BlockSpec((tb, D), lambda i: (i, 0)),
            # Resident parameters: constant index_map -> fetched once.
            pl.BlockSpec((D, H), lambda i: (0, 0)),
            pl.BlockSpec((1, H), lambda i: (0, 0)),
            pl.BlockSpec((1, H), lambda i: (0, 0)),
            # Scalar bias via SMEM (no padded VMEM tile / DMA bookkeeping).
            pl.BlockSpec(memory_space=pltpu.MemorySpace.SMEM),
        ],
        # Output last-dim is 1 (masked stores); TB is large so writeback bytes are
        # tiny relative to x reads and the cost is amortized.
        out_specs=pl.BlockSpec((tb, 1), lambda i: (i, 0)),
        compiler_params=pltpu.CompilerParams(
            dimension_semantics=("parallel",),        # shard batch across v7x's 2 TCs
            vmem_limit_bytes=32 * 1024 * 1024,
        ),
    )(x, w1, b1, w2, b2)

    return out[:B] if b_padded != B else out


def init_params(key, input_dim, hidden=16):
    """Deterministic init mimicking nn.Linear's uniform(-1/sqrt(fan_in), 1/sqrt(fan_in))."""
    k1, k2, k3, k4 = jax.random.split(key, 4)
    bound1 = 1.0 / jnp.sqrt(input_dim)
    bound2 = 1.0 / jnp.sqrt(hidden)
    w1 = jax.random.uniform(k1, (input_dim, hidden), jnp.float32, -bound1, bound1)
    b1 = jax.random.uniform(k2, (1, hidden), jnp.float32, -bound1, bound1)
    w2 = jax.random.uniform(k3, (1, hidden), jnp.float32, -bound2, bound2)  # PyTorch layout
    b2 = jax.random.uniform(k4, (1, 1), jnp.float32, -bound2, bound2)
    return w1, b1, w2, b2


if __name__ == "__main__":
    key = jax.random.PRNGKey(0)
    kx, kp, kx2 = jax.random.split(key, 3)

    # Small demo: batch=8, input_dim=32, hidden=16.
    B, D, H = 8, 32, 16
    x = jax.random.normal(kx, (B, D), dtype=jnp.float32)
    w1, b1, w2, b2 = init_params(kp, D, H)

    out = jax.block_until_ready(discriminator_forward(x, w1, b1, w2, b2))

    # Reference (same math as the PyTorch module). Exact sigmoid -> tight tolerance.
    ref = jax.nn.sigmoid(jnp.maximum(x @ w1 + b1, 0.0) @ w2.T + b2)
    assert out.shape == (B, 1)
    assert bool(jnp.all((out > 0.0) & (out < 1.0)))
    assert jnp.allclose(out, ref, atol=1e-5, rtol=1e-5)

    # Exercise the batch grid + padding path (B not a multiple of the tile).
    B2 = 300
    x2 = jax.random.normal(kx2, (B2, D), dtype=jnp.float32)
    out2 = jax.block_until_ready(
        discriminator_forward(x2, w1, b1, w2, b2, tb_max=128)
    )
    ref2 = jax.nn.sigmoid(jnp.maximum(x2 @ w1 + b1, 0.0) @ w2.T + b2)
    assert out2.shape == (B2, 1)
    assert jnp.allclose(out2, ref2, atol=1e-5, rtol=1e-5)

    print("KERNEL_OK")
</pallas_src>

<mosaic_0001>
module attributes {stable_mosaic.version = 11 : i64} {
  func.func @discriminator_kernel(%arg0: i32, %arg1: memref<8x32xf32, #tpu.memory_space<vmem>>, %arg2: memref<32x16xf32, #tpu.memory_space<vmem>>, %arg3: memref<1x16xf32, #tpu.memory_space<vmem>>, %arg4: memref<1x16xf32, #tpu.memory_space<vmem>>, %arg5: memref<1x1xf32, #tpu.memory_space<smem>>, %arg6: memref<8x1xf32, #tpu.memory_space<vmem>>) attributes {dimension_semantics = [#tpu.dimension_semantics<parallel>], iteration_bounds = array<i64: 1>, scalar_prefetch = 0 : i64, scratch_operands = 0 : i64, tpu.core_type = #tpu.core_type<tc>, window_params = [{transform_indices = @transform_0, window_bounds = array<i64: 8, 32>}, {pipeline_mode = #tpu.pipeline_mode<synchronous>, transform_indices = @transform_1, window_bounds = array<i64: 32, 16>}, {pipeline_mode = #tpu.pipeline_mode<synchronous>, transform_indices = @transform_2, window_bounds = array<i64: 1, 16>}, {pipeline_mode = #tpu.pipeline_mode<synchronous>, transform_indices = @transform_3, window_bounds = array<i64: 1, 16>}, {transform_indices = @transform_4, window_bounds = array<i64: 1, 1>}, {transform_indices = @transform_5, window_bounds = array<i64: 8, 1>}]} {
    %c0 = arith.constant 0 : index
    %c0_0 = arith.constant 0 : index
    %0 = vector.load %arg1[%c0, %c0_0] : memref<8x32xf32, #tpu.memory_space<vmem>>, vector<8x32xf32>
    %c0_1 = arith.constant 0 : index
    %c0_2 = arith.constant 0 : index
    %1 = vector.load %arg2[%c0_1, %c0_2] : memref<32x16xf32, #tpu.memory_space<vmem>>, vector<32x16xf32>
    %cst = arith.constant dense<0.000000e+00> : vector<8x16xf32>
    %2 = tpu.matmul %0, %1, %cst {dimension_numbers = #tpu.dot_dimension_numbers<[1], [0], [0], [1], [0, 0, 1, 1], [], []>} : vector<8x32xf32>, vector<32x16xf32>, vector<8x16xf32> -> vector<8x16xf32>
    %c0_3 = arith.constant 0 : index
    %c0_4 = arith.constant 0 : index
    %3 = vector.load %arg3[%c0_3, %c0_4] : memref<1x16xf32, #tpu.memory_space<vmem>>, vector<1x16xf32>
    %4 = vector.broadcast %3 : vector<1x16xf32> to vector<8x16xf32>
    %5 = arith.addf %2, %4 : vector<8x16xf32>
    %cst_5 = arith.constant 0.000000e+00 : f32
    %6 = vector.broadcast %cst_5 : f32 to vector<8x16xf32>
    %7 = arith.maximumf %5, %6 : vector<8x16xf32>
    %c0_6 = arith.constant 0 : index
    %c0_7 = arith.constant 0 : index
    %8 = vector.load %arg4[%c0_6, %c0_7] : memref<1x16xf32, #tpu.memory_space<vmem>>, vector<1x16xf32>
    %9 = vector.broadcast %8 : vector<1x16xf32> to vector<8x16xf32>
    %10 = arith.mulf %7, %9 : vector<8x16xf32>
    %cst_8 = arith.constant dense<0.000000e+00> : vector<8xf32>
    %11 = vector.multi_reduction <add>, %10, %cst_8 [1] : vector<8x16xf32> to vector<8xf32>
    %12 = vector.shape_cast %11 : vector<8xf32> to vector<8x1xf32>
    %c0_9 = arith.constant 0 : index
    %c0_10 = arith.constant 0 : index
    %13 = memref.load %arg5[%c0_9, %c0_10] : memref<1x1xf32, #tpu.memory_space<smem>>
    %14 = vector.broadcast %13 : f32 to vector<8x1xf32>
    %15 = arith.addf %12, %14 : vector<8x1xf32>
    %cst_11 = arith.constant 0.000000e+00 : f32
    %16 = vector.broadcast %cst_11 : f32 to vector<8x1xf32>
    %17 = arith.subf %16, %15 : vector<8x1xf32>
    %18 = math.exp %17 : vector<8x1xf32>
    %cst_12 = arith.constant 1.000000e+00 : f32
    %19 = vector.broadcast %cst_12 : f32 to vector<8x1xf32>
    %20 = arith.addf %19, %18 : vector<8x1xf32>
    %cst_13 = arith.constant 1.000000e+00 : f32
    %21 = vector.broadcast %cst_13 : f32 to vector<8x1xf32>
    %22 = arith.divf %21, %20 : vector<8x1xf32>
    %c0_14 = arith.constant 0 : index
    %c0_15 = arith.constant 0 : index
    %23 = vector.load %arg6[%c0_14, %c0_15] : memref<8x1xf32, #tpu.memory_space<vmem>>, vector<8x1xf32>
    tpu.vector_store %arg6[%c0_14, %c0_15], %22 {strides = array<i32>} : memref<8x1xf32, #tpu.memory_space<vmem>>, vector<8x1xf32>,
    return
  }
  func.func @transform_0(%arg0: i32) -> (i32, i32) {
    %c0_i32 = arith.constant 0 : i32
    %c0_i32_0 = arith.constant 0 : i32
    return %arg0, %c0_i32 : i32, i32
  }
  func.func @transform_1(%arg0: i32) -> (i32, i32) {
    %c0_i32 = arith.constant 0 : i32
    %c0_i32_0 = arith.constant 0 : i32
    %c0_i32_1 = arith.constant 0 : i32
    return %c0_i32, %c0_i32_0 : i32, i32
  }
  func.func @transform_2(%arg0: i32) -> (i32, i32) {
    %c0_i32 = arith.constant 0 : i32
    %c0_i32_0 = arith.constant 0 : i32
    %c0_i32_1 = arith.constant 0 : i32
    return %c0_i32, %c0_i32_0 : i32, i32
  }
  func.func @transform_3(%arg0: i32) -> (i32, i32) {
    %c0_i32 = arith.constant 0 : i32
    %c0_i32_0 = arith.constant 0 : i32
    %c0_i32_1 = arith.constant 0 : i32
    return %c0_i32, %c0_i32_0 : i32, i32
  }
  func.func @transform_4(%arg0: i32) -> (i32, i32) {
    %c0_i32 = arith.constant 0 : i32
    %c0_i32_0 = arith.constant 0 : i32
    %c0_i32_1 = arith.constant 0 : i32
    return %c0_i32, %c0_i32_0 : i32, i32
  }
  func.func @transform_5(%arg0: i32) -> (i32, i32) {
    %c0_i32 = arith.constant 0 : i32
    %c0_i32_0 = arith.constant 0 : i32
    return %arg0, %c0_i32 : i32, i32
  }
}

</mosaic_0001>

<bundles_post_ra>
// kernel: tpu_custom_call.1
= control target key start
LH: loop header
LB: loop body
LE: loop exit
PB: predicated region body
PF: predicated region fallthrough
CT: control target
= control target key end

     0   :  { %vm30_vm0 = vcmask 261120   ;;  %vm60_vm1 = vcmask 130048   ;;  %vm86_vm5 = vcmask 7168   ;;  %s156_s1 = inlined_call_operand.vmem [shape: f32[32,16], index: 1, kind: input, shape index: {}]   ;;  %s157_s2 = inlined_call_operand.vmem [shape: f32[1,16], index: 2, kind: input, shape index: {}]   ;;  %s158_s0 = inlined_call_operand.vmem [shape: f32[8,32], index: 0, kind: input, shape index: {}]   ;;  %s159_s3 = inlined_call_operand.vmem [shape: f32[1,16], index: 3, kind: input, shape index: {}]   ;;  %s160_s4 = inlined_call_operand.<no memory space> [shape: f32[1,1], index: 4, kind: input, shape index: {}]   ;;  %s161_s5 = inlined_call_operand.vmem [shape: f32[8,1], index: 5, kind: output, shape index: {}]  }
   0x1   :  { %v25_v0 = vld [vmem:[%s156_s1 + $0x18] sm:$0xff]  ;;  %v24_v1 = vld [vmem:[%s156_s1 + $0x10] sm:$0xff]  ;;  %v23_v2 = vld [vmem:[%s156_s1 + $0x8] sm:$0xff]  ;;  %v65_v12 = vstv %s160_s4 }
   0x2   :  { %46 = vmatpush.msra.mxu0 %v25_v0  ;;  %v22_v3 = vld [vmem:[%s156_s1] sm:$0xff] }
   0x3   :  { %v21_v4 = vld [vmem:[%s158_s0] sm:$0xff] }
   0x4   :  { %47 = vmatpush.msra.mxu0 %v24_v1  ;;  %v93_v5 = vld [vmem:[%s157_s2] ss:$0 sm:$0xff] }
   0x5   :  { %v94_v8 = vld [vmem:[%s159_s3] ss:$0 sm:$0xff] }
   0x6   :  { %48 = vmatpush.msra.mxu0 %v23_v2 }
   0x8   :  { %49 = vmatpush.msra.mxu0 %v22_v3 }
   0x9   :  { %92 = vmatmul.msk.f32.vlgmr.msra.gmra.mxu0 %vm30_vm0, %v21_v4 }
  0x86   :  { %v51_v6 = vpop.f32.mrf.mxu0 }
  0x87   :  { %v52_v7 = vadd.f32 %v93_v5, %v51_v6 }
  0x89   :  { %v54_v9 = vmax.f32 %v52_v7, 0.0 }
  0x8b   :  { %v59_v10 = vmul.f32 %v94_v8, %v54_v9 }
  0x8d   :  { %v61_v11 = vsel %vm60_vm1, %v59_v10, 0.0 }
  0x8e   :  { %62 = vadd.xlane.f32.xlu0 %v61_v11 }
 0x101   :  { %v63_v13 = vpop.xlane.xlu0 %62 }
 0x102   :  { %v66_v14 = vadd.f32 %v65_v12, %v63_v13 }
 0x104   :  { %v67_v15 = vsub.f32 0.0, %v66_v14 }
 0x106   :  { %v68_v16 = vmul.f32 1.442695, %v67_v15 }
 0x108   :  { %95 = vpow2.f32 %v68_v16 }
 0x10e   :  { %v96_v17 = vpop.eup %95 }
 0x10f   :  { %v70_v18 = vadd.f32 1.0, %v96_v17 }
 0x111   :  { %97 = vrcp.f32 %v70_v18  ;;  %v82_v22 = vand.u32 2147483648, %v70_v18  ;;  %v80_v24 = vand.u32 2147483647, %v70_v18  ;;  %vm76_vm3 = vweird.f32 %v70_v18 }
 0x113   :  { %v83_v26 = vor.u32 1.1754944e-38, %v82_v22  ;;  %vm81_vm6 = vcmp.eq.f32.partialorder %v80_v24, 8.507059e+37 }
 0x117   :  { %v98_v19 = vpop.eup %97 }
 0x118   :  { %v72_v20 = vmul.f32 %v98_v19, %v70_v18  ;;  %vm77_vm2 = vweird.f32 %v98_v19 }
 0x119   :  { %vm78_vm4 = vmor %vm76_vm3, %vm77_vm2 }
 0x11a   :  { %v73_v21 = vsub.f32 1.0, %v72_v20 }
 0x11c   :  { %v74_v23 = vmul.f32 %v98_v19, %v73_v21 }
 0x11e   :  { %v75_v25 = vadd.f32 %v98_v19, %v74_v23 }
 0x120   :  { %v79_v27 = vsel %vm78_vm4, %v98_v19, %v75_v25 }
 0x121   :  { %v84_v28 = vsel %vm81_vm6, %v83_v26, %v79_v27 }
 0x122   :  { %87 = vst.msk [vmem:[%s161_s5] sm:$0xff] %vm86_vm5, %v84_v28 }

</bundles_post_ra>
